<compile_context>
chip_gen: v7x
topology: tpu7x:2x2x1
jax: 0.10.0
libtpu: 0.0.40
codegen_flags: <defaults>
</compile_context>

<pallas_src>
import functools

import jax
import jax.numpy as jnp
import numpy as np
from jax.experimental import pallas as pl
from jax.experimental.pallas import tpu as pltpu

LANE = 128


# ------------------------------ small helpers ------------------------------ #

def _round_up(n, m):
    return (n + m - 1) // m * m


# ----------------------------- Pallas kernel ------------------------------- #

def _fused_layer_kernel(et_ref, src_ref, dn_ref, nreal_ref,          # SMEM prefetch
                        adj_ref, xsrc_ref, wn_ref, xdst_ref, wself_ref,
                        bias_ref, gamma_ref, beta_ref, *rest,
                        eps, neg_slope, apply_act, emit_proj, n_pad):
    """One grid step = (dst type d, incoming-edge slot s, source-node K tile k).

    Accumulates  sum_s adj_s @ (x_src_s @ W_neigh_s) + x_dst @ W_self_sum + b_sum
    into an f32 VMEM scratch (bf16 MXU operands, f32 accumulation).  On the
    last (s, k) step: masked two-pass BatchNorm1d (+ optional LeakyReLU), then
    stores either the activations (layer 1) or the folded edge-MLP projections
    (layer 2) exactly once, lane-dense where the width allows it.
    """
    if emit_proj:
        wproj_ref, out_ref, acc_ref = rest
    else:
        out_ref, acc_ref = rest
        wproj_ref = None

    d = pl.program_id(0)
    s = pl.program_id(1)
    k = pl.program_id(2)
    last_s = pl.num_programs(1) - 1
    last_k = pl.num_programs(2) - 1

    @pl.when(jnp.logical_and(s == 0, k == 0))
    def _init():
        # Self path: W_self / bias are pre-summed over this dst type's edge types.
        acc_ref[...] = (
            jnp.dot(xdst_ref[...], wself_ref[...],
                    preferred_element_type=jnp.float32)
            + bias_ref[...])

    # Neighbor path, project-first: adj_tile @ (x_src_tile @ W_neigh).
    # The K (source-node) reduction distributes over tiles; operands are bf16,
    # the accumulator is f32.
    proj = jnp.dot(xsrc_ref[...], wn_ref[...], preferred_element_type=jnp.float32)
    acc_ref[...] += jnp.dot(adj_ref[...], proj.astype(adj_ref.dtype),
                            preferred_element_type=jnp.float32)

    @pl.when(jnp.logical_and(s == last_s, k == last_k))
    def _epilogue():
        acc = acc_ref[...]
        n_real = nreal_ref[d]
        rows = jax.lax.broadcasted_iota(jnp.int32, (n_pad, 1), 0)
        valid = rows < n_real
        inv_n = 1.0 / n_real.astype(jnp.float32)
        # Two-pass BatchNorm statistics over the REAL rows only (padded rows
        # excluded from mean/var and from inv_n).
        mean = jnp.sum(jnp.where(valid, acc, 0.0), axis=0, keepdims=True) * inv_n
        diff = jnp.where(valid, acc - mean, 0.0)
        var = jnp.sum(diff * diff, axis=0, keepdims=True) * inv_n
        y = (acc - mean) * jax.lax.rsqrt(var + eps) * gamma_ref[...] + beta_ref[...]
        if apply_act:
            y = jnp.where(y > 0, y, neg_slope * y)
        if emit_proj:
            # Layer-2 epilogue fold: per-node edge-MLP projections, stored as a
            # lane-dense (n_pad, 128) slab in one store.
            out_ref[...] = jnp.dot(y, wproj_ref[...],
                                   preferred_element_type=jnp.float32
                                   ).astype(out_ref.dtype)
        else:
            out_ref[...] = y.astype(out_ref.dtype)


def fused_hetero_layer(x_stack, adj_stack, wn_stack, wself_stack, bias_stack,
                       gamma_stack, beta_stack, tables, *, n_pad, tk,
                       apply_act, wproj_stack=None, out_dtype=jnp.bfloat16,
                       eps=1e-5, neg_slope=0.01):
    """One fused pallas_call for a whole hetero layer (all destination types)."""
    et_tbl, src_tbl, dn_tbl, nreal = tables
    n_types = int(x_stack.shape[0])
    feat_w = int(x_stack.shape[2])
    hid = int(wn_stack.shape[2])
    t_dst = int(dn_tbl.shape[0])
    s_max = int(et_tbl.shape[0]) // t_dst
    k_tiles = n_pad // tk
    emit_proj = wproj_stack is not None
    out_w = int(wproj_stack.shape[2]) if emit_proj else hid
    if emit_proj:
        out_dtype = jnp.float32

    # --- index maps: routed by the scalar-prefetched SMEM tables ---
    def adj_map(d, s, k, et, src, dn, nr):
        return (et[d * s_max + s], 0, k)

    def xsrc_map(d, s, k, et, src, dn, nr):
        return (src[d * s_max + s], k, 0)

    def wn_map(d, s, k, et, src, dn, nr):
        return (et[d * s_max + s], 0, 0)

    def dst_map(d, s, k, et, src, dn, nr):
        return (dn[d], 0, 0)

    in_specs = [
        pl.BlockSpec((None, n_pad, tk), adj_map),        # normalized adjacency (bf16)
        pl.BlockSpec((None, tk, feat_w), xsrc_map),      # source features (bf16)
        pl.BlockSpec((None, feat_w, hid), wn_map),       # W_neigh (bf16)
        pl.BlockSpec((None, n_pad, feat_w), dst_map),    # destination features (bf16)
        pl.BlockSpec((None, feat_w, hid), dst_map),      # W_self (summed, bf16)
        pl.BlockSpec((None, 1, hid), dst_map),           # bias (summed, f32)
        pl.BlockSpec((None, 1, hid), dst_map),           # BN gamma (f32)
        pl.BlockSpec((None, 1, hid), dst_map),           # BN beta (f32)
    ]
    args = [adj_stack, x_stack, wn_stack, x_stack, wself_stack, bias_stack,
            gamma_stack, beta_stack]
    if emit_proj:
        in_specs.append(pl.BlockSpec((None, hid, out_w), dst_map))  # edge-MLP proj W
        args.append(wproj_stack)

    out_spec = pl.BlockSpec((None, n_pad, out_w), dst_map)
    out_shape = jax.ShapeDtypeStruct((n_types, n_pad, out_w), out_dtype)

    kernel = functools.partial(
        _fused_layer_kernel, eps=eps, neg_slope=neg_slope,
        apply_act=apply_act, emit_proj=emit_proj, n_pad=n_pad)

    # Advisory cost estimate for the XLA scheduler.
    flops = (2 * t_dst * n_pad * feat_w * hid                        # self path
             + 2 * t_dst * s_max * n_pad * (feat_w + n_pad) * hid)   # neighbor path
    if emit_proj:
        flops += 2 * t_dst * n_pad * hid * out_w
    bytes_accessed = int(sum(int(np.prod(a.shape)) * a.dtype.itemsize for a in args)
                         + n_types * n_pad * out_w * np.dtype(out_dtype).itemsize)
    cost = pl.CostEstimate(flops=int(flops), transcendentals=int(t_dst * hid),
                           bytes_accessed=bytes_accessed)

    # Explicit VMEM budget: double-buffered input blocks + f32 accumulator +
    # output block; clamped to stay inside v7x's 64 MiB physical VMEM while
    # raising v5e's 16 MiB scoped default.
    blk_bytes = (2 * (n_pad * tk + tk * feat_w + feat_w * hid + n_pad * feat_w) * 2
                 + 2 * n_pad * out_w * np.dtype(out_dtype).itemsize
                 + n_pad * hid * 4 + 4 * hid * 4)
    if emit_proj:
        blk_bytes += 2 * hid * out_w * 4
    vmem_limit = int(min(max(4 * blk_bytes, 32 * 1024 * 1024), 60 * 1024 * 1024))

    return pl.pallas_call(
        kernel,
        out_shape=out_shape,
        grid_spec=pltpu.PrefetchScalarGridSpec(
            num_scalar_prefetch=4,
            grid=(t_dst, s_max, k_tiles),
            in_specs=in_specs,
            out_specs=out_spec,
            scratch_shapes=[pltpu.VMEM((n_pad, hid), jnp.float32)]),
        compiler_params=pltpu.CompilerParams(
            dimension_semantics=("parallel", "arbitrary", "arbitrary"),
            vmem_limit_bytes=vmem_limit),
        cost_estimate=cost,
    )(et_tbl, src_tbl, dn_tbl, nreal, *args)


# ------------------------------- JAX glue ---------------------------------- #

def build_norm_adj(edge_idx, n_dst, n_src):
    """Dense mean-aggregation operator: adj[dst, src] = 1 / in_degree(dst)."""
    src, dst = edge_idx[0], edge_idx[1]
    adj = jnp.zeros((n_dst, n_src), jnp.float32).at[dst, src].add(1.0)
    deg = jnp.sum(adj, axis=1, keepdims=True)
    return adj / jnp.maximum(deg, 1.0)


def hetero_gnn_forward(params, x, edge_index, edge_label_index, num_nodes, *, hidden):
    node_types = tuple(x.keys())
    t_idx = {t: i for i, t in enumerate(node_types)}
    edge_types = tuple(edge_index.keys())
    metas = tuple(edge_label_index.keys())
    in_dim = int(next(iter(x.values())).shape[1])

    # ---- node-count padding / K tiling of the source-node contraction axis ----
    n_max = max(int(num_nodes[t]) for t in node_types)
    if n_max > 512:
        tk = 512                              # 128-aligned K tile for non-toy graphs
        n_pad = _round_up(n_max, tk)
    else:
        n_pad = _round_up(n_max, 8)           # full-dim blocks are legal at toy size
        tk = n_pad

    # ---- destination-type routing tables (scalar-prefetched to SMEM) ----
    dst_types = tuple(t for t in node_types if any(et[2] == t for et in edge_types))
    incoming = {t: tuple(et for et in edge_types if et[2] == t) for t in dst_types}
    s_max = max(len(incoming[t]) for t in dst_types)
    n_et = len(edge_types)
    et_idx = {et: i for i, et in enumerate(edge_types)}

    et_tbl = np.full((len(dst_types), s_max), n_et, np.int32)   # default -> zero dummy
    src_tbl = np.zeros((len(dst_types), s_max), np.int32)
    for di, t in enumerate(dst_types):
        for si, et in enumerate(incoming[t]):
            et_tbl[di, si] = et_idx[et]
            src_tbl[di, si] = t_idx[et[0]]
    dn_tbl = np.asarray([t_idx[t] for t in dst_types], np.int32)
    nreal = np.asarray([int(num_nodes[t]) for t in dst_types], np.int32)
    tables = (jnp.asarray(et_tbl.reshape(-1)), jnp.asarray(src_tbl.reshape(-1)),
              jnp.asarray(dn_tbl), jnp.asarray(nreal))

    # ---- stacked, padded operands (bf16 MXU inputs; padded rows/cols are zero) ----
    adj_stack = jnp.zeros((n_et + 1, n_pad, n_pad), jnp.float32)  # slot n_et = zero dummy
    for et in edge_types:
        a = build_norm_adj(edge_index[et], int(num_nodes[et[2]]), int(num_nodes[et[0]]))
        adj_stack = adj_stack.at[et_idx[et], :a.shape[0], :a.shape[1]].set(a)
    adj_stack = adj_stack.astype(jnp.bfloat16)

    x0 = jnp.zeros((len(node_types), n_pad, in_dim), jnp.bfloat16)
    for t in node_types:
        x0 = x0.at[t_idx[t], :x[t].shape[0], :].set(x[t].astype(jnp.bfloat16))

    def conv_params(cname, bname, feat_w):
        wn = jnp.zeros((n_et + 1, feat_w, hidden), jnp.float32)
        for et in edge_types:
            wn = wn.at[et_idx[et]].set(params[cname][et]["w_neigh"])
        ws = jnp.zeros((len(node_types), feat_w, hidden), jnp.float32)
        bs = jnp.zeros((len(node_types), 1, hidden), jnp.float32)
        ga = jnp.zeros((len(node_types), 1, hidden), jnp.float32)
        be = jnp.zeros((len(node_types), 1, hidden), jnp.float32)
        for t in dst_types:
            i = t_idx[t]
            ws = ws.at[i].set(sum(params[cname][et]["w_self"] for et in incoming[t]))
            bs = bs.at[i, 0].set(sum(params[cname][et]["b"] for et in incoming[t]))
            ga = ga.at[i, 0].set(params[bname][t]["gamma"])
            be = be.at[i, 0].set(params[bname][t]["beta"])
        return wn.astype(jnp.bfloat16), ws.astype(jnp.bfloat16), bs, ga, be

    # ---- edge-MLP projection weights, folded into the layer-2 epilogue ----
    proj_count = {t: 0 for t in node_types}
    proj_cols = {}
    for m in metas:
        s_t, _, d_t = m
        proj_cols[(m, 0)] = proj_count[s_t]; proj_count[s_t] += 1
        proj_cols[(m, 1)] = proj_count[d_t]; proj_count[d_t] += 1
    p_pad = _round_up(max(max(proj_count.values()), 1), LANE)  # lane-dense store width
    wproj = np.zeros((len(node_types), hidden, p_pad), np.float32)
    for m in metas:
        s_t, rel, d_t = m
        w = np.asarray(params["edge_mlp"][rel]["w"], np.float32)
        # Linear(concat(src, dst)) == src @ w[:H] + dst @ w[H:] + b
        # (the original module implicitly assumes node_embed_size == hidden_size).
        assert w.shape[0] == 2 * hidden, "edge_mlp expects 2*hidden input width"
        wproj[t_idx[s_t], :, proj_cols[(m, 0)]] = w[:hidden, 0]
        wproj[t_idx[d_t], :, proj_cols[(m, 1)]] = w[hidden:, 0]
    wproj = jnp.asarray(wproj)

    # ---- two fused pallas_calls: conv1+bn1+LeakyReLU and conv2+bn2+link proj ----
    wn1, ws1, b1, g1, be1 = conv_params("conv1", "bn1", in_dim)
    h1 = fused_hetero_layer(x0, adj_stack, wn1, ws1, b1, g1, be1, tables,
                            n_pad=n_pad, tk=tk, apply_act=True)
    wn2, ws2, b2, g2, be2 = conv_params("conv2", "bn2", hidden)
    proj = fused_hetero_layer(h1, adj_stack, wn2, ws2, b2, g2, be2, tables,
                              n_pad=n_pad, tk=tk, apply_act=False,
                              wproj_stack=wproj)

    # ---- O(E) link-score gather + bias (plain-JAX glue, per review option) ----
    pred = {}
    for m in metas:
        s_t, rel, d_t = m
        eli = edge_label_index[m]
        ps = proj[t_idx[s_t], eli[0], proj_cols[(m, 0)]]
        pd = proj[t_idx[d_t], eli[1], proj_cols[(m, 1)]]
        pred[m] = ps + pd + params["edge_mlp"][rel]["b"][0]
    return pred


def reference_forward(params, x, edge_index, edge_label_index, num_nodes):
    """Pure-JAX (unpadded, f32) reference with the PyTorch module's semantics."""
    adjs = {et: build_norm_adj(ei, num_nodes[et[2]], num_nodes[et[0]])
            for et, ei in edge_index.items()}

    def bn(v, p, act):
        mean = jnp.mean(v, axis=0, keepdims=True)
        var = jnp.mean((v - mean) ** 2, axis=0, keepdims=True)
        y = (v - mean) / jnp.sqrt(var + 1e-5) * p["gamma"] + p["beta"]
        return jnp.where(y > 0, y, 0.01 * y) if act else y

    def layer(cname, bname, feats, act):
        h = {}
        for et in edge_index:
            s, _, d = et
            p = params[cname][et]
            out = adjs[et] @ feats[s] @ p["w_neigh"] + feats[d] @ p["w_self"] + p["b"]
            h[d] = out if d not in h else h[d] + out
        return {d: bn(h[d], params[bname][d], act) for d in h}

    h1 = layer("conv1", "bn1", x, True)
    h2 = layer("conv2", "bn2", h1, False)
    pred = {}
    for mt, eli in edge_label_index.items():
        s, r, d = mt
        cat = jnp.concatenate([h2[s][eli[0]], h2[d][eli[1]]], axis=-1)
        p = params["edge_mlp"][r]
        pred[mt] = (cat @ p["w"] + p["b"]).reshape(-1)
    return pred


# --------------------------------- Main ------------------------------------ #

if __name__ == "__main__":
    hidden = 32          # hidden_size
    embed = 32           # node_embed_size (original module requires embed == hidden)
    n_user, n_item = 16, 12
    n_edges = 24
    n_label = 8

    node_types = ("user", "item")
    edge_types = (("user", "u2i", "item"), ("item", "i2u", "user"))
    num_nodes = {"user": n_user, "item": n_item}

    keys = iter(jax.random.split(jax.random.PRNGKey(0), 64))

    x = {
        "user": jax.random.normal(next(keys), (n_user, embed), jnp.float32),
        "item": jax.random.normal(next(keys), (n_item, embed), jnp.float32),
    }

    edge_index, edge_label_index = {}, {}
    for et in edge_types:
        s, _, d = et
        src = jax.random.randint(next(keys), (n_edges,), 0, num_nodes[s])
        dst = jax.random.randint(next(keys), (n_edges,), 0, num_nodes[d])
        edge_index[et] = jnp.stack([src, dst])
        lsrc = jax.random.randint(next(keys), (n_label,), 0, num_nodes[s])
        ldst = jax.random.randint(next(keys), (n_label,), 0, num_nodes[d])
        edge_label_index[et] = jnp.stack([lsrc, ldst])

    def lin_init(k, shape, scale=0.1):
        return scale * jax.random.normal(k, shape, jnp.float32)

    params = {"conv1": {}, "conv2": {}, "bn1": {}, "bn2": {}, "edge_mlp": {}}
    for et in edge_types:
        for cname, in_dim in (("conv1", embed), ("conv2", hidden)):
            params[cname][et] = {
                "w_neigh": lin_init(next(keys), (in_dim, hidden)),
                "w_self": lin_init(next(keys), (in_dim, hidden)),
                "b": lin_init(next(keys), (hidden,)),
            }
        params["edge_mlp"][et[1]] = {
            "w": lin_init(next(keys), (2 * embed, 1)),   # nn.Linear(node_embed_size*2, 1)
            "b": lin_init(next(keys), (1,)),
        }
    for nt in node_types:
        for bname in ("bn1", "bn2"):
            params[bname][nt] = {
                "gamma": jnp.ones((hidden,), jnp.float32),
                "beta": jnp.zeros((hidden,), jnp.float32),
            }

    pred = hetero_gnn_forward(params, x, edge_index, edge_label_index, num_nodes,
                              hidden=hidden)
    for v in pred.values():
        jax.block_until_ready(v)

    # Correctness check against an unpadded pure-f32 JAX reference of the same
    # math.  The kernel feeds the MXU bf16 operands (per the perf review), so
    # rounding differs from the f32 reference; 4e-2 comfortably covers that.
    with jax.default_matmul_precision("float32"):
        ref = reference_forward(params, x, edge_index, edge_label_index, num_nodes)
    for mt in pred:
        assert pred[mt].shape == (n_label,)
        np.testing.assert_allclose(np.asarray(pred[mt]), np.asarray(ref[mt]),
                                   rtol=4e-2, atol=4e-2)

    print("KERNEL_OK")
</pallas_src>

<mosaic_0001>
module attributes {stable_mosaic.version = 11 : i64} {
  func.func @_fused_layer_kernel(%arg0: i32, %arg1: i32, %arg2: i32, %arg3: memref<2xi32, #tpu.memory_space<smem>>, %arg4: memref<2xi32, #tpu.memory_space<smem>>, %arg5: memref<2xi32, #tpu.memory_space<smem>>, %arg6: memref<2xi32, #tpu.memory_space<smem>>, %arg7: memref<1x16x16xbf16, #tpu.memory_space<vmem>>, %arg8: memref<1x16x32xbf16, #tpu.memory_space<vmem>>, %arg9: memref<1x32x32xbf16, #tpu.memory_space<vmem>>, %arg10: memref<1x16x32xbf16, #tpu.memory_space<vmem>>, %arg11: memref<1x32x32xbf16, #tpu.memory_space<vmem>>, %arg12: memref<1x1x32xf32, #tpu.memory_space<vmem>>, %arg13: memref<1x1x32xf32, #tpu.memory_space<vmem>>, %arg14: memref<1x1x32xf32, #tpu.memory_space<vmem>>, %arg15: memref<1x16x32xbf16, #tpu.memory_space<vmem>>, %arg16: memref<16x32xf32, #tpu.memory_space<vmem>>) attributes {dimension_semantics = [#tpu.dimension_semantics<parallel>, #tpu.dimension_semantics<arbitrary>, #tpu.dimension_semantics<arbitrary>], iteration_bounds = array<i64: 2, 1, 1>, scalar_prefetch = 4 : i64, scratch_operands = 1 : i64, tpu.core_type = #tpu.core_type<tc>, window_params = [{transform_indices = @transform_0, window_bounds = array<i64: 1, 16, 16>}, {transform_indices = @transform_1, window_bounds = array<i64: 1, 16, 32>}, {transform_indices = @transform_2, window_bounds = array<i64: 1, 32, 32>}, {transform_indices = @transform_3, window_bounds = array<i64: 1, 16, 32>}, {transform_indices = @transform_4, window_bounds = array<i64: 1, 32, 32>}, {transform_indices = @transform_5, window_bounds = array<i64: 1, 1, 32>}, {transform_indices = @transform_6, window_bounds = array<i64: 1, 1, 32>}, {transform_indices = @transform_7, window_bounds = array<i64: 1, 1, 32>}, {transform_indices = @transform_8, window_bounds = array<i64: 1, 16, 32>}]} {
    %c0_i32 = arith.constant 0 : i32
    %0 = arith.cmpi eq, %arg1, %c0_i32 : i32
    %c0_i32_0 = arith.constant 0 : i32
    %1 = arith.cmpi eq, %arg2, %c0_i32_0 : i32
    %2 = arith.andi %0, %1 : i1
    %3 = arith.extui %2 : i1 to i32
    %c0_i32_1 = arith.constant 0 : i32
    %4 = arith.cmpi ne, %3, %c0_i32_1 : i32
    scf.if %4 {
      %c0_18 = arith.constant 0 : index
      %c0_19 = arith.constant 0 : index
      %c0_20 = arith.constant 0 : index
      %22 = vector.load %arg10[%c0_18, %c0_19, %c0_20] : memref<1x16x32xbf16, #tpu.memory_space<vmem>>, vector<1x16x32xbf16>
      %23 = vector.shape_cast %22 : vector<1x16x32xbf16> to vector<16x32xbf16>
      %c0_21 = arith.constant 0 : index
      %c0_22 = arith.constant 0 : index
      %c0_23 = arith.constant 0 : index
      %24 = vector.load %arg11[%c0_21, %c0_22, %c0_23] : memref<1x32x32xbf16, #tpu.memory_space<vmem>>, vector<1x32x32xbf16>
      %25 = vector.shape_cast %24 : vector<1x32x32xbf16> to vector<32x32xbf16>
      %cst_24 = arith.constant dense<0.000000e+00> : vector<16x32xf32>
      %26 = tpu.matmul %23, %25, %cst_24 {dimension_numbers = #tpu.dot_dimension_numbers<[1], [0], [0], [1], [0, 0, 1, 1], [], []>} : vector<16x32xbf16>, vector<32x32xbf16>, vector<16x32xf32> -> vector<16x32xf32>
      %c0_25 = arith.constant 0 : index
      %c0_26 = arith.constant 0 : index
      %c0_27 = arith.constant 0 : index
      %27 = vector.load %arg12[%c0_25, %c0_26, %c0_27] : memref<1x1x32xf32, #tpu.memory_space<vmem>>, vector<1x1x32xf32>
      %28 = vector.shape_cast %27 : vector<1x1x32xf32> to vector<1x32xf32>
      %29 = vector.broadcast %28 : vector<1x32xf32> to vector<16x32xf32>
      %30 = arith.addf %26, %29 : vector<16x32xf32>
      %c0_28 = arith.constant 0 : index
      %c0_29 = arith.constant 0 : index
      %31 = vector.load %arg16[%c0_28, %c0_29] : memref<16x32xf32, #tpu.memory_space<vmem>>, vector<16x32xf32>
      tpu.vector_store %arg16[%c0_28, %c0_29], %30 {strides = array<i32>} : memref<16x32xf32, #tpu.memory_space<vmem>>, vector<16x32xf32>,
    } else {
    }
    %c0 = arith.constant 0 : index
    %c0_2 = arith.constant 0 : index
    %c0_3 = arith.constant 0 : index
    %5 = vector.load %arg8[%c0, %c0_2, %c0_3] : memref<1x16x32xbf16, #tpu.memory_space<vmem>>, vector<1x16x32xbf16>
    %6 = vector.shape_cast %5 : vector<1x16x32xbf16> to vector<16x32xbf16>
    %c0_4 = arith.constant 0 : index
    %c0_5 = arith.constant 0 : index
    %c0_6 = arith.constant 0 : index
    %7 = vector.load %arg9[%c0_4, %c0_5, %c0_6] : memref<1x32x32xbf16, #tpu.memory_space<vmem>>, vector<1x32x32xbf16>
    %8 = vector.shape_cast %7 : vector<1x32x32xbf16> to vector<32x32xbf16>
    %cst = arith.constant dense<0.000000e+00> : vector<16x32xf32>
    %9 = tpu.matmul %6, %8, %cst {dimension_numbers = #tpu.dot_dimension_numbers<[1], [0], [0], [1], [0, 0, 1, 1], [], []>} : vector<16x32xbf16>, vector<32x32xbf16>, vector<16x32xf32> -> vector<16x32xf32>
    %c0_7 = arith.constant 0 : index
    %c0_8 = arith.constant 0 : index
    %10 = vector.load %arg16[%c0_7, %c0_8] : memref<16x32xf32, #tpu.memory_space<vmem>>, vector<16x32xf32>
    %c0_9 = arith.constant 0 : index
    %c0_10 = arith.constant 0 : index
    %c0_11 = arith.constant 0 : index
    %11 = vector.load %arg7[%c0_9, %c0_10, %c0_11] : memref<1x16x16xbf16, #tpu.memory_space<vmem>>, vector<1x16x16xbf16>
    %12 = vector.shape_cast %11 : vector<1x16x16xbf16> to vector<16x16xbf16>
    %13 = arith.truncf %9 : vector<16x32xf32> to vector<16x32xbf16>
    %cst_12 = arith.constant dense<0.000000e+00> : vector<16x32xf32>
    %14 = tpu.matmul %12, %13, %cst_12 {dimension_numbers = #tpu.dot_dimension_numbers<[1], [0], [0], [1], [0, 0, 1, 1], [], []>} : vector<16x16xbf16>, vector<16x32xbf16>, vector<16x32xf32> -> vector<16x32xf32>
    %15 = arith.addf %10, %14 : vector<16x32xf32>
    %c0_13 = arith.constant 0 : index
    %c0_14 = arith.constant 0 : index
    %16 = vector.load %arg16[%c0_13, %c0_14] : memref<16x32xf32, #tpu.memory_space<vmem>>, vector<16x32xf32>
    tpu.vector_store %arg16[%c0_13, %c0_14], %15 {strides = array<i32>} : memref<16x32xf32, #tpu.memory_space<vmem>>, vector<16x32xf32>,
    %c0_i32_15 = arith.constant 0 : i32
    %17 = arith.cmpi eq, %arg1, %c0_i32_15 : i32
    %c0_i32_16 = arith.constant 0 : i32
    %18 = arith.cmpi eq, %arg2, %c0_i32_16 : i32
    %19 = arith.andi %17, %18 : i1
    %20 = arith.extui %19 : i1 to i32
    %c0_i32_17 = arith.constant 0 : i32
    %21 = arith.cmpi ne, %20, %c0_i32_17 : i32
    scf.if %21 {
      %c0_18 = arith.constant 0 : index
      %c0_19 = arith.constant 0 : index
      %22 = vector.load %arg16[%c0_18, %c0_19] : memref<16x32xf32, #tpu.memory_space<vmem>>, vector<16x32xf32>
      %23 = arith.index_cast %arg0 : i32 to index
      %24 = memref.load %arg6[%23] : memref<2xi32, #tpu.memory_space<smem>>
      %25 = tpu.iota {dimensions = array<i32: 0>} : vector<16x1xi32>
      %26 = vector.broadcast %24 : i32 to vector<16x1xi32>
      %27 = arith.cmpi slt, %25, %26 : vector<16x1xi32>
      %28 = arith.sitofp %24 : i32 to f32
      %cst_20 = arith.constant 1.000000e+00 : f32
      %29 = arith.divf %cst_20, %28 : f32
      %cst_21 = arith.constant 0.000000e+00 : f32
      %30 = vector.shape_cast %27 : vector<16x1xi1> to vector<16x1xi1>
      %31 = vector.broadcast %30 : vector<16x1xi1> to vector<16x32xi1>
      %32 = vector.broadcast %cst_21 : f32 to vector<16x32xf32>
      %33 = arith.select %31, %22, %32 : vector<16x32xi1>, vector<16x32xf32>
      %cst_22 = arith.constant dense<0.000000e+00> : vector<32xf32>
      %34 = vector.multi_reduction <add>, %33, %cst_22 [0] : vector<16x32xf32> to vector<32xf32>
      %35 = vector.shape_cast %34 : vector<32xf32> to vector<1x32xf32>
      %36 = vector.broadcast %29 : f32 to vector<1x32xf32>
      %37 = arith.mulf %35, %36 : vector<1x32xf32>
      %38 = vector.broadcast %37 : vector<1x32xf32> to vector<16x32xf32>
      %39 = arith.subf %22, %38 : vector<16x32xf32>
      %cst_23 = arith.constant 0.000000e+00 : f32
      %40 = vector.shape_cast %27 : vector<16x1xi1> to vector<16x1xi1>
      %41 = vector.broadcast %40 : vector<16x1xi1> to vector<16x32xi1>
      %42 = vector.broadcast %cst_23 : f32 to vector<16x32xf32>
      %43 = arith.select %41, %39, %42 : vector<16x32xi1>, vector<16x32xf32>
      %44 = arith.mulf %43, %43 : vector<16x32xf32>
      %cst_24 = arith.constant dense<0.000000e+00> : vector<32xf32>
      %45 = vector.multi_reduction <add>, %44, %cst_24 [0] : vector<16x32xf32> to vector<32xf32>
      %46 = vector.shape_cast %45 : vector<32xf32> to vector<1x32xf32>
      %47 = vector.broadcast %29 : f32 to vector<1x32xf32>
      %48 = arith.mulf %46, %47 : vector<1x32xf32>
      %49 = vector.broadcast %37 : vector<1x32xf32> to vector<16x32xf32>
      %50 = arith.subf %22, %49 : vector<16x32xf32>
      %cst_25 = arith.constant 9.99999974E-6 : f32
      %51 = vector.broadcast %cst_25 : f32 to vector<1x32xf32>
      %52 = arith.addf %48, %51 : vector<1x32xf32>
      %53 = math.rsqrt %52 : vector<1x32xf32>
      %54 = vector.broadcast %53 : vector<1x32xf32> to vector<16x32xf32>
      %55 = arith.mulf %50, %54 : vector<16x32xf32>
      %c0_26 = arith.constant 0 : index
      %c0_27 = arith.constant 0 : index
      %c0_28 = arith.constant 0 : index
      %56 = vector.load %arg13[%c0_26, %c0_27, %c0_28] : memref<1x1x32xf32, #tpu.memory_space<vmem>>, vector<1x1x32xf32>
      %57 = vector.shape_cast %56 : vector<1x1x32xf32> to vector<1x32xf32>
      %58 = vector.broadcast %57 : vector<1x32xf32> to vector<16x32xf32>
      %59 = arith.mulf %55, %58 : vector<16x32xf32>
      %c0_29 = arith.constant 0 : index
      %c0_30 = arith.constant 0 : index
      %c0_31 = arith.constant 0 : index
      %60 = vector.load %arg14[%c0_29, %c0_30, %c0_31] : memref<1x1x32xf32, #tpu.memory_space<vmem>>, vector<1x1x32xf32>
      %61 = vector.shape_cast %60 : vector<1x1x32xf32> to vector<1x32xf32>
      %62 = vector.broadcast %61 : vector<1x32xf32> to vector<16x32xf32>
      %63 = arith.addf %59, %62 : vector<16x32xf32>
      %cst_32 = arith.constant 0.000000e+00 : f32
      %64 = vector.broadcast %cst_32 : f32 to vector<16x32xf32>
      %65 = arith.cmpf ogt, %63, %64 : vector<16x32xf32>
      %cst_33 = arith.constant 0.00999999977 : f32
      %66 = vector.broadcast %cst_33 : f32 to vector<16x32xf32>
      %67 = arith.mulf %66, %63 : vector<16x32xf32>
      %68 = arith.select %65, %63, %67 : vector<16x32xi1>, vector<16x32xf32>
      %69 = arith.truncf %68 : vector<16x32xf32> to vector<16x32xbf16>
      %c0_34 = arith.constant 0 : index
      %c0_35 = arith.constant 0 : index
      %c0_36 = arith.constant 0 : index
      %70 = vector.load %arg15[%c0_34, %c0_35, %c0_36] : memref<1x16x32xbf16, #tpu.memory_space<vmem>>, vector<1x16x32xbf16>
      %71 = vector.shape_cast %70 : vector<1x16x32xbf16> to vector<16x32xbf16>
      %72 = vector.shape_cast %69 : vector<16x32xbf16> to vector<1x16x32xbf16>
      tpu.vector_store %arg15[%c0_34, %c0_35, %c0_36], %72 {strides = array<i32>} : memref<1x16x32xbf16, #tpu.memory_space<vmem>>, vector<1x16x32xbf16>,
    } else {
    }
    return
  }
  func.func @transform_0(%arg0: i32, %arg1: i32, %arg2: i32, %arg3: memref<2xi32, #tpu.memory_space<smem>>, %arg4: memref<2xi32, #tpu.memory_space<smem>>, %arg5: memref<2xi32, #tpu.memory_space<smem>>, %arg6: memref<2xi32, #tpu.memory_space<smem>>) -> (i32, i32, i32) {
    %c1_i32 = arith.constant 1 : i32
    %0 = arith.muli %arg0, %c1_i32 : i32
    %1 = arith.addi %0, %arg1 : i32
    %2 = arith.index_cast %1 : i32 to index
    %3 = memref.load %arg3[%2] : memref<2xi32, #tpu.memory_space<smem>>
    %c0_i32 = arith.constant 0 : i32
    %c0_i32_0 = arith.constant 0 : i32
    return %3, %c0_i32, %arg2 : i32, i32, i32
  }
  func.func @transform_1(%arg0: i32, %arg1: i32, %arg2: i32, %arg3: memref<2xi32, #tpu.memory_space<smem>>, %arg4: memref<2xi32, #tpu.memory_space<smem>>, %arg5: memref<2xi32, #tpu.memory_space<smem>>, %arg6: memref<2xi32, #tpu.memory_space<smem>>) -> (i32, i32, i32) {
    %c1_i32 = arith.constant 1 : i32
    %0 = arith.muli %arg0, %c1_i32 : i32
    %1 = arith.addi %0, %arg1 : i32
    %2 = arith.index_cast %1 : i32 to index
    %3 = memref.load %arg4[%2] : memref<2xi32, #tpu.memory_space<smem>>
    %c0_i32 = arith.constant 0 : i32
    %c0_i32_0 = arith.constant 0 : i32
    return %3, %arg2, %c0_i32 : i32, i32, i32
  }
  func.func @transform_2(%arg0: i32, %arg1: i32, %arg2: i32, %arg3: memref<2xi32, #tpu.memory_space<smem>>, %arg4: memref<2xi32, #tpu.memory_space<smem>>, %arg5: memref<2xi32, #tpu.memory_space<smem>>, %arg6: memref<2xi32, #tpu.memory_space<smem>>) -> (i32, i32, i32) {
    %c1_i32 = arith.constant 1 : i32
    %0 = arith.muli %arg0, %c1_i32 : i32
    %1 = arith.addi %0, %arg1 : i32
    %2 = arith.index_cast %1 : i32 to index
    %3 = memref.load %arg3[%2] : memref<2xi32, #tpu.memory_space<smem>>
    %c0_i32 = arith.constant 0 : i32
    %c0_i32_0 = arith.constant 0 : i32
    %c0_i32_1 = arith.constant 0 : i32
    return %3, %c0_i32, %c0_i32_0 : i32, i32, i32
  }
  func.func @transform_3(%arg0: i32, %arg1: i32, %arg2: i32, %arg3: memref<2xi32, #tpu.memory_space<smem>>, %arg4: memref<2xi32, #tpu.memory_space<smem>>, %arg5: memref<2xi32, #tpu.memory_space<smem>>, %arg6: memref<2xi32, #tpu.memory_space<smem>>) -> (i32, i32, i32) {
    %0 = arith.index_cast %arg0 : i32 to index
    %1 = memref.load %arg5[%0] : memref<2xi32, #tpu.memory_space<smem>>
    %c0_i32 = arith.constant 0 : i32
    %c0_i32_0 = arith.constant 0 : i32
    %c0_i32_1 = arith.constant 0 : i32
    return %1, %c0_i32, %c0_i32_0 : i32, i32, i32
  }
  func.func @transform_4(%arg0: i32, %arg1: i32, %arg2: i32, %arg3: memref<2xi32, #tpu.memory_space<smem>>, %arg4: memref<2xi32, #tpu.memory_space<smem>>, %arg5: memref<2xi32, #tpu.memory_space<smem>>, %arg6: memref<2xi32, #tpu.memory_space<smem>>) -> (i32, i32, i32) {
    %0 = arith.index_cast %arg0 : i32 to index
    %1 = memref.load %arg5[%0] : memref<2xi32, #tpu.memory_space<smem>>
    %c0_i32 = arith.constant 0 : i32
    %c0_i32_0 = arith.constant 0 : i32
    %c0_i32_1 = arith.constant 0 : i32
    return %1, %c0_i32, %c0_i32_0 : i32, i32, i32
  }
  func.func @transform_5(%arg0: i32, %arg1: i32, %arg2: i32, %arg3: memref<2xi32, #tpu.memory_space<smem>>, %arg4: memref<2xi32, #tpu.memory_space<smem>>, %arg5: memref<2xi32, #tpu.memory_space<smem>>, %arg6: memref<2xi32, #tpu.memory_space<smem>>) -> (i32, i32, i32) {
    %0 = arith.index_cast %arg0 : i32 to index
    %1 = memref.load %arg5[%0] : memref<2xi32, #tpu.memory_space<smem>>
    %c0_i32 = arith.constant 0 : i32
    %c0_i32_0 = arith.constant 0 : i32
    %c0_i32_1 = arith.constant 0 : i32
    return %1, %c0_i32, %c0_i32_0 : i32, i32, i32
  }
  func.func @transform_6(%arg0: i32, %arg1: i32, %arg2: i32, %arg3: memref<2xi32, #tpu.memory_space<smem>>, %arg4: memref<2xi32, #tpu.memory_space<smem>>, %arg5: memref<2xi32, #tpu.memory_space<smem>>, %arg6: memref<2xi32, #tpu.memory_space<smem>>) -> (i32, i32, i32) {
    %0 = arith.index_cast %arg0 : i32 to index
    %1 = memref.load %arg5[%0] : memref<2xi32, #tpu.memory_space<smem>>
    %c0_i32 = arith.constant 0 : i32
    %c0_i32_0 = arith.constant 0 : i32
    %c0_i32_1 = arith.constant 0 : i32
    return %1, %c0_i32, %c0_i32_0 : i32, i32, i32
  }
  func.func @transform_7(%arg0: i32, %arg1: i32, %arg2: i32, %arg3: memref<2xi32, #tpu.memory_space<smem>>, %arg4: memref<2xi32, #tpu.memory_space<smem>>, %arg5: memref<2xi32, #tpu.memory_space<smem>>, %arg6: memref<2xi32, #tpu.memory_space<smem>>) -> (i32, i32, i32) {
    %0 = arith.index_cast %arg0 : i32 to index
    %1 = memref.load %arg5[%0] : memref<2xi32, #tpu.memory_space<smem>>
    %c0_i32 = arith.constant 0 : i32
    %c0_i32_0 = arith.constant 0 : i32
    %c0_i32_1 = arith.constant 0 : i32
    return %1, %c0_i32, %c0_i32_0 : i32, i32, i32
  }
  func.func @transform_8(%arg0: i32, %arg1: i32, %arg2: i32, %arg3: memref<2xi32, #tpu.memory_space<smem>>, %arg4: memref<2xi32, #tpu.memory_space<smem>>, %arg5: memref<2xi32, #tpu.memory_space<smem>>, %arg6: memref<2xi32, #tpu.memory_space<smem>>) -> (i32, i32, i32) {
    %0 = arith.index_cast %arg0 : i32 to index
    %1 = memref.load %arg5[%0] : memref<2xi32, #tpu.memory_space<smem>>
    %c0_i32 = arith.constant 0 : i32
    %c0_i32_0 = arith.constant 0 : i32
    %c0_i32_1 = arith.constant 0 : i32
    return %1, %c0_i32, %c0_i32_0 : i32, i32, i32
  }
}

</mosaic_0001>

<bundles_post_ra>
// kernel: tpu_custom_call.1
= control target key start
LH: loop header
LB: loop body
LE: loop exit
PB: predicated region body
PF: predicated region fallthrough
CT: control target
= control target key end

     0   :  { %s2531_s0 = inlined_call_operand.hbm [shape: s32[2], index: 0, kind: input, shape index: {}]   ;;  %s2532_s4 = inlined_call_operand.hbm [shape: bf16[3,16,16], index: 4, kind: input, shape index: {}]   ;;  %s2533_s5 = inlined_call_operand.vmem [shape: bf16[2,16,32], index: 5, kind: input, shape index: {}]   ;;  %s2534_s6 = inlined_call_operand.hbm [shape: bf16[3,32,32], index: 6, kind: input, shape index: {}]   ;;  %s2535_s7 = inlined_call_operand.hbm [shape: bf16[2,16,32], index: 7, kind: input, shape index: {}]   ;;  %s2536_s8 = inlined_call_operand.hbm [shape: bf16[2,32,32], index: 8, kind: input, shape index: {}]   ;;  %s2537_s9 = inlined_call_operand.vmem [shape: f32[2,1,32], index: 9, kind: input, shape index: {}]   ;;  %s2538_s10 = inlined_call_operand.vmem [shape: f32[2,1,32], index: 10, kind: input, shape index: {}]   ;;  %s2539_s11 = inlined_call_operand.vmem [shape: f32[2,1,32], index: 11, kind: input, shape index: {}]   ;;  %s2540_s12 = inlined_call_operand.hbm [shape: bf16[2,16,32], index: 12, kind: output, shape index: {}]   ;;  %s2541_s1 = inlined_call_operand.hbm [shape: s32[2], index: 1, kind: input, shape index: {}]   ;;  %s2542_s2 = inlined_call_operand.hbm [shape: s32[2], index: 2, kind: input, shape index: {}]   ;;  %s2543_s3 = inlined_call_operand.hbm [shape: s32[2], index: 3, kind: input, shape index: {}]  }
   0x1   :  { %2572 = sst [smem:[#allocation47_spill]] %s2532_s4  ;;  %s1423_s23 = scalar_lea.hbm %s2531_s0, 16 }
   0x2   :  { %2573 = sst [smem:[#allocation48_spill]] %s2533_s5  ;;  %p1424_p0 = scmp.ne.s32.totalorder %s2531_s0, %s1423_s23 }
   0x3   :  { %2574 = sst [smem:[#allocation49_spill]] %s2534_s6  ;;  %p1427_p1 = scmp.lt.u32.totalorder %s1423_s23, %s2531_s0 }
   0x4   :  { %2575 = sst [smem:[#allocation50_spill]] %s2535_s7 }
   0x5   :  { %2576 = sst [smem:[#allocation51_spill]] %s2536_s8  ;;  %p1429_p2 = pnand %p1427_p1, %p1424_p0 }
   0x6   :  { %2577 = sst [smem:[#allocation52_spill]] %s2537_s9 }
   0x7   :  { %2578 = sst [smem:[#allocation53_spill]] %s2538_s10 }
   0x8   :  { %2579 = sst [smem:[#allocation54_spill]] %s2539_s11 }
   0x9   :  { %2580 = sst [smem:[#allocation55_spill]] %s2540_s12 }
   0xa   :  { %1432 = shalt.err (!%p1429_p2)  }
   0xb   :  { %s1777_s28 = smov [#allocation4]   ;;  %s1433_s15 = scalar_lea.hbm %s2541_s1, 16 }
   0xc   :  { %18 = dma.hbm_to_smem %s2531_s0, 16, %s1777_s28, [#allocation3] }
   0xd   :  { %p1434_p3 = scmp.ne.s32.totalorder %s2541_s1, %s1433_s15  ;;  %p1437_p4 = scmp.lt.u32.totalorder %s1433_s15, %s2541_s1 }
   0xf   :  { %p1439_p5 = pnand %p1437_p4, %p1434_p3 }
  0x11   :  { %1442 = shalt.err (!%p1439_p5)  }
  0x12   :  { %s1778_s20 = smov [#allocation5]   ;;  %s1443_s24 = scalar_lea.hbm %s2542_s2, 16 }
  0x13   :  { %20 = dma.hbm_to_smem %s2541_s1, 16, %s1778_s20, [#allocation3] }
  0x14   :  { %p1444_p6 = scmp.ne.s32.totalorder %s2542_s2, %s1443_s24  ;;  %p1447_p7 = scmp.lt.u32.totalorder %s1443_s24, %s2542_s2 }
  0x16   :  { %p1449_p8 = pnand %p1447_p7, %p1444_p6 }
  0x18   :  { %1452 = shalt.err (!%p1449_p8)  }
  0x19   :  { %s1779_s29 = smov [#allocation6]   ;;  %s1453_s15 = scalar_lea.hbm %s2543_s3, 16 }
  0x1a   :  { %22 = dma.hbm_to_smem %s2542_s2, 16, %s1779_s29, [#allocation3] }
  0x1b   :  { %p1454_p9 = scmp.ne.s32.totalorder %s2543_s3, %s1453_s15  ;;  %p1457_p10 = scmp.lt.u32.totalorder %s1453_s15, %s2543_s3 }
  0x1d   :  { %p1459_p11 = pnand %p1457_p10, %p1454_p9 }
  0x1f   :  { %1462 = shalt.err (!%p1459_p11)  }
  0x20   :  { %s1780_s20 = smov [#allocation7]  }
  0x21   :  { %24 = dma.hbm_to_smem %s2543_s3, 16, %s1780_s20, [#allocation3] }
  0x22   :  { %1683 = dma.done.wait [#allocation3], 64 }
  0x23   :  { %1684 = vsyncadd [#allocation3], 4294967232 }
  0x24   :  { %26 = sfence }
  0x25   :  { %27 = vsyncpa [#allocation9], 0 }
  0x26   :  { %29 = vsyncpa [#allocation9 + $0x1], 0 }
  0x27   :  { %30 = vsyncpa [#allocation12], 0 }
  0x28   :  { %32 = vsyncpa [#allocation12 + $0x1], 0 }
  0x29   :  { %33 = vsyncpa [#allocation15], 0 }
  0x2a   :  { %35 = vsyncpa [#allocation15 + $0x1], 0 }
  0x2b   :  { %36 = vsyncpa [#allocation10], 0 }
  0x2c   :  { %38 = vsyncpa [#allocation10 + $0x1], 0  ;;  %s1905_s2 = smov 0   ;;  %s1907_s0 = smov 0  }
  0x2d   :  { %s1909_s23 = smov 0   ;;  %s1911_s24 = smov 0  }
  0x2e   :  { %s1913_s3 = smov 0   ;;  %s1915_s25 = smov 0  }
  0x2f   :  { %s1917_s26 = smov 0   ;;  %s1919_s27 = smov 0  }
  0x30   :  { %s1921_s28 = smov 0   ;;  %s1923_s29 = smov 0  }
  0x31   :  { %s1925_s30 = smov 0   ;;  %s1927_s13 = smov 0  }
  0x32   :  { %s1929_s1 = smov 0   ;;  %s1931_s14 = smov 0  }
  0x33   :  { %s1933_s15 = smov 0   ;;  %s1935_s16 = smov 0  }
  0x34   :  { %s1937_s17 = smov 0   ;;  %s1939_s18 = smov 0  }
  0x35 LB: > { %2581 = sst [smem:[#allocation32_spill]] %s1707_s2  ;;  %s1994_s19 = sadd.s32 4294967295, %s1775_s18   ;;  %s1775_s18 = sphi %s1939_s18, %s44_s18   ;;  %s1771_s17 = sphi %s1937_s17, %s2680_s17   ;;  %s1767_s16 = sphi %s1935_s16, %s2679_s16   ;;  %s1763_s15 = sphi %s1933_s15, %s2678_s15   ;;  %s1759_s14 = sphi %s1931_s14, %s2677_s14   ;;  %s1755_s1 = sphi %s1929_s1, %s2676_s1   ;;  %s1751_s13 = sphi %s1927_s13, %s2675_s13   ;;  %s1747_s30 = sphi %s1925_s30, %s2674_s30   ;;  %s1743_s29 = sphi %s1923_s29, %s2660_s29   ;;  %s1739_s28 = sphi %s1921_s28, %s2673_s28   ;;  %s1735_s27 = sphi %s1919_s27, %s2672_s27   ;;  %s1731_s26 = sphi %s1917_s26, %s2671_s26   ;;  %s1727_s25 = sphi %s1915_s25, %s2670_s25   ;;  %s1723_s3 = sphi %s1913_s3, %s2669_s3   ;;  %s1719_s24 = sphi %s1911_s24, %s2668_s24   ;;  %s1715_s23 = sphi %s1909_s23, %s2667_s23   ;;  %s1711_s0 = sphi %s1907_s0, %s2666_s0   ;;  %s1707_s2 = sphi %s1905_s2, %s2656_s2  }
  0x36   : > { %2582 = sst [smem:[#allocation33_spill]] %s1711_s0  ;;  %s1128_s20 = sadd.s32 4294967294, %s1775_s18  }
  0x37   : > { %2583 = sst [smem:[#allocation34_spill]] %s1719_s24  ;;  %s63_s21 = sadd.s32 1, %s1771_s17 }
  0x38   : > { %2584 = sst [smem:[#allocation35_spill]] %s1739_s28  ;;  %p2557_p12 = scmp.eq.s32.totalorder %s1775_s18, 0 }
  0x39   : > { %2585 = sst [smem:[#allocation36_spill]] %s1747_s30  ;;  %p65_p13 = scmp.ge.s32.totalorder %s63_s21, 2 }
  0x3a   : > { %2586 = sst [smem:[#allocation37_spill]] %s1751_s13  ;;  %p2558_p0 = scmp.eq.s32.totalorder %s1994_s19, 0 }
  0x3b   : > { %2587 = sst [smem:[#allocation38_spill]] %s1763_s15  ;;  %s138_s12 = sadd.s32 1, %s1751_s13 }
  0x3c   : > { %2588 = sst [smem:[#allocation39_spill]] %s1767_s16  ;;  %s2682_s21 = smov (%p65_p13, %s63_s21), 0 }
  0x3d   : > { %s132_s22 = sld [smem:[#allocation4 + %s1771_s17]]  ;;  %p145_p1 = scmp.ne.s32.totalorder %s1751_s13, %s1747_s30 }
  0x3e   : > { %2589 = sst [smem:[#allocation40_spill]] %s2682_s21  ;;  %p151_p2 = scmp.ne.s32.totalorder %s1747_s30, %s1743_s29 }
  0x3f   : > { %s134_s11 = sld [smem:[#allocation4 + %s2682_s21]]  ;;  %p2011_p3 = por %p145_p1, %p2557_p12 }
  0x40   : > { %s301_s10 = sld [smem:[#allocation6 + %s1771_s17]]  ;;  %p2017_p4 = por %p151_p2, %p2558_p0 }
  0x41   : > { %s302_s16 = sld [smem:[#allocation6 + %s2682_s21]]  ;;  %s306_s8 = sadd.s32 1, %s1715_s23 }
  0x42   : > { %s2591_s5 = scalar_select %p2017_p4, 1, 0 }
  0x43   : > { %p316_p5 = scmp.ne.s32.totalorder %s1715_s23, %s1711_s0  ;;  %p317_p6 = scmp.eq.s32.totalorder %s1994_s19, 1 }
  0x44   : > { %2592 = sst [smem:[#allocation41_spill]] %s2591_s5  ;;  %p322_p7 = scmp.ne.s32.totalorder %s1711_s0, %s1707_s2 }
  0x45   : > { %p323_p8 = scmp.eq.s32.totalorder %s1128_s20, 1  ;;  %p2028_p9 = por %p317_p6, %p316_p5 }
  0x46   : > { %s135_s5 = ssub.s32 %s132_s22, %s134_s11  ;;  %p2556_p1 = scmp.lt.s32.totalorder %s1775_s18, 2 }
  0x47   : > { %s2593_s29 = scalar_select %p2028_p9, 1, 0 }
  0x48   : > { %p2033_p11 = por %p323_p8, %p322_p7  ;;  %p136_p13 = scmp.eq.s32.totalorder %s135_s5, 0 }
  0x49   : > { %2594 = sst [smem:[#allocation42_spill]] %s2593_s29  ;;  %s303_s7 = ssub.s32 %s301_s10, %s302_s16 }
  0x4a   : > { %s2595_s30 = scalar_select %p2033_p11, 1, 0 }
  0x4b   : > { %s2039_s2 = scalar_select %p136_p13, %s1751_s13, %s138_s12  }
  0x4c   : > { %p304_p2 = scmp.eq.s32.totalorder %s303_s7, 0  ;;  %s384_s20 = sand.u32 1, %s1775_s18  }
  0x4d   : > { %2596 = sst [smem:[#allocation43_spill]] %s2039_s2  ;;  %s386_s0 = sand.u32 1, %s1751_s13  }
  0x4e   : > { %s2044_s24 = scalar_select %p304_p2, %s1715_s23, %s306_s8  }
  0x4f   : > { %s1134_s29 = sshll.u32 %s386_s0, 4  ;;  %p2050_p5 = pnand %p2556_p1, %p2011_p3 }
  0x50   : > { %2597 = sst [smem:[#allocation44_spill]] %s2044_s24  ;;  %s388_s7 = scalar_lea.vmem [#allocation11], %s1134_s29 }
  0x51   : > { %s1214_s5 = scalar_select %p2011_p3, [#allocation4], [#allocation18] }
  0x52   : > { %s1215_s10 = scalar_select %p2011_p3, %s1771_s17, 0 }
  0x53   : > { %s2684_s5 = smov (!%p2556_p1, %s1214_s5), [#allocation23]  ;;  %s397_s8 = sshll.u32 %s388_s7, 4  ;;  %s2063_s8 = int_to_ptr.vmem [resolvable:$true] %s397_s8 }
  0x54   : > { %s2686_s10 = smov (!%p2556_p1, %s1215_s10), 0  ;;  %p1143_p6 = scmp.ge.s32.totalorder %s1775_s18, 1 }
  0x55   : > { %s390_s12 = sld [smem:[%s2684_s5 + %s2686_s10]]  ;;  %p473_p7 = scmp.lt.s32.totalorder %s1775_s18, 3 }
  0x56   : > { %s2600_s6 = sld [smem:[#allocation49_spill]]  ;;  %s2079_s5 = scalar_lea.sflag [#allocation12], %s384_s20 }
  0x57   : > { %p2067_p8 = pnand %p1143_p6, %p473_p7  ;;  %s2077_s29 = sld [smem:[#allocation4 + %s1771_s17]] }
  0x58   : > { %p1465_p13 = pneg %p2050_p5 }
  0x59   : > { %s2599_s0 = scalar_select %p2067_p8, 1, 0 }
  0x5b   : > { %s1172_s16 = sshll.u32 %s390_s12, 8 }
  0x5c   : > { %s2074_s2 = scalar_lea.hbm %s2600_s6, %s1172_s16  ;;  %s1468_s16 = scalar_lea.hbm %s2600_s6, 768 }
  0x5d   : > { %s1463_s10 = scalar_lea.hbm %s2074_s2, 256  ;;  %p1469_p7 = scmp.lt.u32.totalorder %s2074_s2, %s2600_s6 }
  0x5e   : > { %p1464_p3 = scmp.ne.s32.totalorder %s2074_s2, %s1463_s10  ;;  %p1470_p10 = scmp.lt.u32.totalorder %s1468_s16, %s1463_s10 }
  0x5f   : > { %p1472_p12 = scmp.lt.u32.totalorder %s1463_s10, %s2074_s2 }
  0x60   : > { %p1466_p2 = pnand %p1465_p13, %p1464_p3  ;;  %p1471_p1 = por %p1470_p10, %p1469_p7 }
  0x62   : > { %p1467_p6 = pneg %p1466_p2  ;;  %p1473_p0 = por %p1472_p12, %p1471_p1 }
  0x64   : > { %p1474_p11 = pnand %p1473_p0, %p1467_p6 }
  0x66   : > { %1477 = shalt.err (!%p1474_p11)
}
  0x67   : > { %s1478_s20 = scalar_lea.vmem %s2063_s8, 256  ;;  %s1781_s7 = smov [#allocation11]  }
  0x68   : > { %p1479_p3 = scmp.ne.s32.totalorder %s2063_s8, %s1478_s20  ;;  %s1483_s12 = sshll.u32 %s1781_s7, 4  ;;  %s1484_s12 = int_to_ptr.vmem [resolvable:$false] %s1483_s12 }
  0x69   : > { %s1485_s9 = scalar_lea.vmem %s1484_s12, 512  ;;  %p1486_p4 = scmp.lt.s32.totalorder %s2063_s8, %s1484_s12 }
  0x6a   : > { %p1481_p2 = pnand %p1479_p3, %p1465_p13  ;;  %p1487_p10 = scmp.lt.s32.totalorder %s1485_s9, %s1478_s20 }
  0x6c   : > { %p1482_p9 = pneg %p1481_p2  ;;  %p1488_p7 = por %p1487_p10, %p1486_p4 }
  0x6e   : > { %p1489_p12 = pnand %p1488_p7, %p1482_p9 }
  0x70   : > { %1492 = shalt.err (!%p1489_p12)
}
  0x71   : > { %s2561_s10 = smov 64   ;;  %s2563_s16 = smov 4  }
  0x72   : > { %1241 = dma.hbm_to_vmem [thread:$0]  (!%p2050_p5), %s2074_s2, 256, %s2063_s8, %s2079_s5, %s2561_s10, %s2561_s10, %s2563_s16  }
  0x73   : > { %s70_s22 = sld [smem:[#allocation4 + %s2682_s21]]  ;;  %p83_p0 = scmp.ne.s32.totalorder %s1763_s15, %s1759_s14 }
  0x74   : > { %p89_p4 = scmp.ne.s32.totalorder %s1759_s14, %s1755_s1  ;;  %s76_s20 = sadd.s32 1, %s1763_s15 }
  0x75   : > { %s343_s7 = sand.u32 1, %s1763_s15   ;;  %p2601_p9 = scmp.eq.s32.totalorder %s1994_s19, 0 }
  0x76   : > { %p2603_p1 = scmp.eq.s32.totalorder %s1775_s18, 0  ;;  %s1131_s2 = sshll.u32 %s343_s7, 3 }
  0x77   : > { %p2119_p11 = por %p2601_p9, %p89_p4  ;;  %p2604_p5 = scmp.lt.s32.totalorder %s1775_s18, 2 }
  0x78   : > { %p85_p13 = por %p2603_p1, %p83_p0  ;;  %s347_s8 = scalar_lea.vmem [#allocation8], %s1131_s2 }
  0x79   : > { %s2602_s12 = scalar_select %p2119_p11, 1, 0 }
  0x7a   : > { %s71_s11 = ssub.s32 %s2077_s29, %s70_s22  ;;  %p2128_p6 = pnand %p2604_p5, %p85_p13 }
  0x7b   : > { %p74_p3 = scmp.eq.s32.totalorder %s71_s11, 0  ;;  %s357_s9 = sshll.u32 %s347_s8, 4  ;;  %s2143_s9 = int_to_ptr.vmem [resolvable:$true] %s357_s9 }
  0x7c   : > { %s1211_s10 = scalar_select %p85_p13, [#allocation4], [#allocation17] }
  0x7d   : > { %s2133_s16 = scalar_select %p74_p3, %s1763_s15, %s76_s20  }
  0x7e   : > { %s1212_s6 = scalar_select %p85_p13, %s1771_s17, 0 }
  0x7f   : > { %2606 = sst [smem:[#allocation45_spill]] %s2133_s16  ;;  %p2607_p2 = pmov %p2604_p5 }
  0x80   : > { %s2141_s22 = sld [smem:[#allocation6 + %s1771_s17]]  ;;  %p173_p7 = scmp.ne.s32.totalorder %s1739_s28, %s1735_s27 }
  0x81   : > { %s2688_s10 = smov (!%p2607_p2, %s1211_s10), [#allocation22]  ;;  %p2608_p10 = pmov %p2607_p2 }
  0x82   : > { %s2146_s11 = sld [smem:[#allocation6 + %s2682_s21]]  ;;  %p179_p12 = scmp.ne.s32.totalorder %s1735_s27, %s1731_s26 }
  0x83   : > { %s2690_s6 = smov (!%p2608_p10, %s1212_s6), 0  ;;  %p2609_p0 = pmov %p2603_p1 }
  0x84   : > { %s349_s29 = sld [smem:[%s2688_s10 + %s2690_s6]]  ;;  %p2167_p1 = por %p179_p12, %p2601_p9 }
  0x85   : > { %p2156_p4 = por %p173_p7, %p2609_p0  ;;  %s2611_s4 = sld [smem:[#allocation47_spill]] }
  0x86   : > { %s2612_s26 = scalar_select %p2167_p1, 1, 0 }
  0x87   : > { %s2171_s10 = scalar_lea.sflag [#allocation9], %s343_s7  ;;  %p1495_p5 = pneg %p2128_p6 }
  0x8a   : > { %s1171_s20 = sshll.u32 %s349_s29, 7 }
  0x8b   : > { %s2163_s6 = scalar_lea.hbm %s2611_s4, %s1171_s20  ;;  %s1498_s20 = scalar_lea.hbm %s2611_s4, 384 }
  0x8c   : > { %s1493_s29 = scalar_lea.hbm %s2163_s6, 128  ;;  %p1499_p10 = scmp.lt.u32.totalorder %s2163_s6, %s2611_s4 }
  0x8d   : > { %p1494_p13 = scmp.ne.s32.totalorder %s2163_s6, %s1493_s29  ;;  %p1500_p7 = scmp.lt.u32.totalorder %s1498_s20, %s1493_s29 }
  0x8e   : > { %p1502_p0 = scmp.lt.u32.totalorder %s1493_s29, %s2163_s6 }
  0x8f   : > { %p1496_p3 = pnand %p1495_p5, %p1494_p13  ;;  %p1501_p12 = por %p1500_p7, %p1499_p10 }
  0x91   : > { %p1497_p2 = pneg %p1496_p3  ;;  %p1503_p9 = por %p1502_p0, %p1501_p12 }
  0x93   : > { %p1504_p1 = pnand %p1503_p9, %p1497_p2 }
  0x95   : > { %1507 = shalt.err (!%p1504_p1)
}
  0x96   : > { %s1508_s7 = scalar_lea.vmem %s2143_s9, 128  ;;  %s1784_s13 = smov [#allocation8]  }
  0x97   : > { %p1509_p13 = scmp.ne.s32.totalorder %s2143_s9, %s1508_s7  ;;  %s1513_s15 = sshll.u32 %s1784_s13, 4  ;;  %s1514_s15 = int_to_ptr.vmem [resolvable:$false] %s1513_s15 }
  0x98   : > { %s1515_s2 = scalar_lea.vmem %s1514_s15, 256  ;;  %p1516_p8 = scmp.lt.s32.totalorder %s2143_s9, %s1514_s15 }
  0x99   : > { %p1511_p3 = pnand %p1509_p13, %p1495_p5  ;;  %p1517_p10 = scmp.lt.s32.totalorder %s1515_s2, %s1508_s7 }
  0x9b   : > { %p1512_p11 = pneg %p1511_p3  ;;  %p1518_p7 = por %p1517_p10, %p1516_p8 }
  0x9d   : > { %p1519_p12 = pnand %p1518_p7, %p1512_p11 }
  0x9f   : > { %1522 = shalt.err (!%p1519_p12)
}
  0xa0   : > { %s2613_s8 = smov 4   ;;  %s2614_s29 = smov 64  }
  0xa1   : > { %1236 = dma.hbm_to_vmem [thread:$0]  (!%p2128_p6), %s2163_s6, 128, %s2143_s9, %s2171_s10, %s2614_s29, %s2614_s29, %s2613_s8  }
  0xa2   : > { %s163_s1 = ssub.s32 %s2141_s22, %s2146_s11  ;;  %s2615_s20 = sand.u32 1, %s1739_s28  }
  0xa3   : > { %s1137_s7 = sshll.u32 %s2615_s20, 3  ;;  %s2616_s13 = sld [smem:[#allocation34_spill]] }
  0xa4   : > { %p164_p8 = scmp.eq.s32.totalorder %s163_s1, 0  ;;  %s2617_s2 = sadd.s32 1, %s1739_s28 }
  0xa5   : > { %s1217_s15 = scalar_select %p2156_p4, [#allocation6], [#allocation19] }
  0xa6   : > { %s2211_s4 = scalar_select %p164_p8, %s1739_s28, %s2617_s2  }
  0xa7   : > { %s1218_s24 = scalar_select %p2156_p4, %s1771_s17, 0 }
  0xa8   : > { %2618 = sst [smem:[#allocation46_spill]] %s2211_s4  ;;  %p2619_p11 = scmp.lt.s32.totalorder %s1775_s18, 2 }
  0xa9   : > { %s411_s11 = scalar_lea.vmem [#allocation13], %s1137_s7  ;;  %s2229_s10 = sld [smem:[#allocation6 + %s1771_s17]] }
  0xaa   : > { %s2692_s15 = smov (!%p2619_p11, %s1217_s15), [#allocation24]  ;;  %p2620_p1 = pmov %p2619_p11 }
  0xab   : > { %s419_s6 = sshll.u32 %s411_s11, 4  ;;  %s2232_s1 = sld [smem:[#allocation6 + %s2682_s21]]  ;;  %s2234_s6 = int_to_ptr.vmem [resolvable:$true] %s419_s6 }
  0xac   : > { %s2694_s24 = smov (!%p2620_p1, %s1218_s24), 0  ;;  %p2621_p6 = pmov %p2620_p1 }
  0xad   : > { %s412_s22 = sld [smem:[%s2692_s15 + %s2694_s24]]  ;;  %p207_p0 = scmp.ne.s32.totalorder %s1723_s3, %s2616_s13 }
  0xae   : > { %p2224_p5 = pnand %p2621_p6, %p2156_p4  ;;  %s2623_s4 = sld [smem:[#allocation50_spill]] }
  0xaf   : > { %s194_s24 = sadd.s32 1, %s1727_s25 }
  0xb0   : > { %p1525_p9 = pneg %p2224_p5 }
  0xb3   : > { %s1173_s20 = sshll.u32 %s412_s22, 7 }
  0xb4   : > { %s2243_s28 = scalar_lea.hbm %s2623_s4, %s1173_s20  ;;  %s1528_s11 = scalar_lea.hbm %s2623_s4, 256 }
  0xb5   : > { %s1523_s7 = scalar_lea.hbm %s2243_s28, 128  ;;  %p1529_p10 = scmp.lt.u32.totalorder %s2243_s28, %s2623_s4 }
  0xb6   : > { %p1524_p4 = scmp.ne.s32.totalorder %s2243_s28, %s1523_s7  ;;  %p1530_p7 = scmp.lt.u32.totalorder %s1528_s11, %s1523_s7 }
  0xb7   : > { %p1532_p8 = scmp.lt.u32.totalorder %s1523_s7, %s2243_s28 }
  0xb8   : > { %p1526_p13 = pnand %p1525_p9, %p1524_p4  ;;  %p1531_p12 = por %p1530_p7, %p1529_p10 }
  0xba   : > { %p1527_p3 = pneg %p1526_p13  ;;  %p1533_p11 = por %p1532_p8, %p1531_p12 }
  0xbc   : > { %p1534_p1 = pnand %p1533_p11, %p1527_p3 }
  0xbe   : > { %1537 = shalt.err (!%p1534_p1)
}
  0xbf   : > { %s1538_s2 = scalar_lea.vmem %s2234_s6, 128  ;;  %s1785_s15 = smov [#allocation13]  }
  0xc0   : > { %p1539_p6 = scmp.ne.s32.totalorder %s2234_s6, %s1538_s2  ;;  %s1543_s22 = sshll.u32 %s1785_s15, 4  ;;  %s1544_s22 = int_to_ptr.vmem [resolvable:$false] %s1543_s22 }
  0xc1   : > { %s1545_s16 = scalar_lea.vmem %s1544_s22, 256  ;;  %p1546_p2 = scmp.lt.s32.totalorder %s2234_s6, %s1544_s22 }
  0xc2   : > { %p1541_p4 = pnand %p1539_p6, %p1525_p9  ;;  %p1547_p10 = scmp.lt.s32.totalorder %s1545_s16, %s1538_s2 }
  0xc4   : > { %p1542_p13 = pneg %p1541_p4  ;;  %p1548_p7 = por %p1547_p10, %p1546_p2 }
  0xc6   : > { %p1549_p12 = pnand %p1548_p7, %p1542_p13 }
  0xc8   : > { %1552 = shalt.err (!%p1549_p12)
}
  0xc9   : > { %1246 = dma.hbm_to_vmem [thread:$0]  (!%p2224_p5), %s2243_s28, 128, %s2234_s6, %s2079_s5, %s2614_s29, %s2614_s29, %s2613_s8  }
  0xca   : > { %p2624_p2 = scmp.eq.s32.totalorder %s1994_s19, 0  ;;  %s429_s7 = sand.u32 1, %s1727_s25  }
  0xcb   : > { %s191_s11 = ssub.s32 %s2229_s10, %s2232_s1  ;;  %p2626_p3 = scmp.eq.s32.totalorder %s1775_s18, 0 }
  0xcc   : > { %p2280_p9 = por %p207_p0, %p2624_p2  ;;  %p2627_p8 = scmp.ne.s32.totalorder %s1727_s25, %s1723_s3 }
  0xcd   : > { %p192_p1 = scmp.eq.s32.totalorder %s191_s11, 0  ;;  %s1140_s20 = sshll.u32 %s429_s7, 4 }
  0xce   : > { %p203_p11 = por %p2627_p8, %p2626_p3  ;;  %p2628_p6 = scmp.lt.s32.totalorder %s1775_s18, 2 }
  0xcf   : > { %s2301_s28 = scalar_select %p192_p1, %s1727_s25, %s194_s24  }
  0xd0   : > { %p2294_p4 = pnand %p2628_p6, %p203_p11  ;;  %p2630_p5 = pmov %p2628_p6 }
  0xd1   : > { %s1220_s5 = scalar_select %p203_p11, [#allocation6], [#allocation20] }
  0xd2   : > { %s1221_s13 = scalar_select %p203_p11, %s1771_s17, 0 }
  0xd3   : > { %s2696_s5 = smov (!%p2630_p5, %s1220_s5), [#allocation25]  ;;  %p2631_p0 = pmov %p2630_p5 }
  0xd4   : > { %s433_s10 = scalar_lea.vmem [#allocation14], %s1140_s20  ;;  %s2632_s11 = sld [smem:[#allocation51_spill]] }
  0xd5   : > { %s2698_s13 = smov (!%p2631_p0, %s1221_s13), 0  ;;  %s441_s1 = sshll.u32 %s433_s10, 4  ;;  %s2308_s1 = int_to_ptr.vmem [resolvable:$true] %s441_s1 }
  0xd6   : > { %s434_s6 = sld [smem:[%s2696_s5 + %s2698_s13]]  ;;  %s2315_s24 = scalar_lea.sflag [#allocation15], %s429_s7 }
  0xd7   : > { %p1555_p10 = pneg %p2294_p4 }
  0xda   : > { %s1558_s13 = scalar_lea.hbm %s2632_s11, 512 }
  0xdc   : > { %s1174_s15 = sshll.u32 %s434_s6, 8 }
  0xdd   : > { %s2313_s4 = scalar_lea.hbm %s2632_s11, %s1174_s15 }
  0xde   : > { %s1553_s21 = scalar_lea.hbm %s2313_s4, 256  ;;  %p1559_p2 = scmp.lt.u32.totalorder %s2313_s4, %s2632_s11 }
  0xdf   : > { %p1554_p13 = scmp.ne.s32.totalorder %s2313_s4, %s1553_s21  ;;  %p1560_p3 = scmp.lt.u32.totalorder %s1558_s13, %s1553_s21 }
  0xe0   : > { %p1562_p11 = scmp.lt.u32.totalorder %s1553_s21, %s2313_s4 }
  0xe1   : > { %p1556_p7 = pnand %p1555_p10, %p1554_p13  ;;  %p1561_p8 = por %p1560_p3, %p1559_p2 }
  0xe3   : > { %p1557_p12 = pneg %p1556_p7  ;;  %p1563_p1 = por %p1562_p11, %p1561_p8 }
  0xe5   : > { %p1564_p6 = pnand %p1563_p1, %p1557_p12 }
  0xe7   : > { %1567 = shalt.err (!%p1564_p6)
}
  0xe8   : > { %s1568_s7 = scalar_lea.vmem %s2308_s1, 256  ;;  %s1786_s15 = smov [#allocation14]  }
  0xe9   : > { %p1569_p5 = scmp.ne.s32.totalorder %s2308_s1, %s1568_s7  ;;  %s1573_s22 = sshll.u32 %s1786_s15, 4  ;;  %s1574_s22 = int_to_ptr.vmem [resolvable:$false] %s1573_s22 }
  0xea   : > { %s1575_s16 = scalar_lea.vmem %s1574_s22, 512  ;;  %p1576_p7 = scmp.lt.s32.totalorder %s2308_s1, %s1574_s22 }
  0xeb   : > { %p1571_p0 = pnand %p1569_p5, %p1555_p10  ;;  %p1577_p2 = scmp.lt.s32.totalorder %s1575_s16, %s1568_s7 }
  0xed   : > { %p1572_p13 = pneg %p1571_p0  ;;  %p1578_p3 = por %p1577_p2, %p1576_p7 }
  0xef   : > { %p1579_p8 = pnand %p1578_p3, %p1572_p13 }
  0xf1   : > { %1582 = shalt.err (!%p1579_p8)
}
  0xf2   : > { %1251 = dma.hbm_to_vmem [thread:$0]  (!%p2294_p4), %s2313_s4, 256, %s2308_s1, %s2315_s24, %s2614_s29, %s2614_s29, %s2613_s8  }
  0xf3   : > { %p2633_p10 = scmp.ne.s32.totalorder %s2599_s0, 0 }
  0xf4   : > { %s479_s21 = sand.u32 (!%p2633_p10), 1, %s1759_s14   ;;  %p2634_p12 = scmp.ne.s32.totalorder (!%p2633_p10), %s2602_s12, 0 }
  0xf5   : > { %477 = sbr.rel (%p2633_p10) target bundleno = 811 (0x32b), region = 52  ;;  %s2349_s20 = sshll.u32 (!%p2633_p10), %s479_s21, 3 }
  0xf6   : > { %s480_s5 = scalar_lea.sflag (!%p2633_p10), [#allocation9], %s479_s21  ;;  %s483_s13 = scalar_lea.vmem (!%p2633_p10), [#allocation8], %s2349_s20 }
  0xfc   : > { %1686 = dma.done.wait (%p2634_p12), %s480_s5, 128  }
  0xfd   : > { %1688 = vsyncadd (%p2634_p12), %s480_s5, 4294967168  ;;  %s2635_s2 = sld [smem:[#allocation36_spill]]  ;;  %s2636_s6 = sld [smem:[#allocation41_spill]] }
  0xfe   : > { %s488_s4 = sand.u32 1, %s1994_s19  }
  0xff   : > { %s489_s29 = scalar_lea.sflag [#allocation12], %s488_s4 }
 0x103   : > { %s490_s8 = sand.u32 1, %s2635_s2   ;;  %p2637_p4 = scmp.ne.s32.totalorder %s2636_s6, 0 }
 0x104   : > { %s1145_s0 = sshll.u32 %s490_s8, 4 }
 0x105   : > { %s492_s1 = scalar_lea.vmem [#allocation11], %s1145_s0 }
 0x106   : > { %1690 = dma.done.wait (%p2637_p4), %s489_s29, 256  }
 0x107   : > { %1692 = vsyncadd (%p2637_p4), %s489_s29, 4294967040  ;;  %s499_s24 = sand.u32 1, %s1735_s27   ;;  %p2638_p11 = scmp.ne.s32.totalorder %s2612_s26, 0 }
 0x108   : > { %s2363_s10 = sshll.u32 %s499_s24, 3 }
 0x109   : > { %s501_s12 = scalar_lea.vmem [#allocation13], %s2363_s10 }
 0x10a   : > { %1694 = dma.done.wait (%p2638_p11), %s489_s29, 128  }
 0x10b   : > { %1696 = vsyncadd (%p2638_p11), %s489_s29, 4294967168  ;;  %s506_s19 = sand.u32 1, %s1723_s3  }
 0x10c   : > { %s1147_s7 = sshll.u32 %s506_s19, 4  ;;  %s507_s15 = scalar_lea.sflag [#allocation15], %s506_s19 }
 0x10d   : > { %s510_s22 = scalar_lea.vmem [#allocation14], %s1147_s7 }
 0x10e   : > { %1698 = dma.done.wait (%p2280_p9), %s507_s15, 256  }
 0x10f   : > { %1700 = vsyncadd (%p2280_p9), %s507_s15, 4294967040  ;;  %s2639_s16 = sld [smem:[#allocation39_spill]]  ;;  %v1787_v0 = vmov 0.0   ;;  %vm1788_vm0 = vmmov 0   ;;  %v1412_v1 = vld [vmem:[%s492_s1] sm:$0xff]   ;;  %v1413_v2 = vld [vmem:[%s492_s1 + $0x8] sm:$0xff]   ;;  %v833_v23 = vlaneseq }
 0x110   : > { %1195 = vmatprep.subr.bf16.mxu1 %v1787_v0  ;;  %1199 = vmatprep.mubr.msk.bf16.mxu1 %vm1788_vm0, %v1787_v0  ;;  %v1415_v3 = vld [vmem:[%s510_s22] sm:$0xff]   ;;  %v1416_v4 = vld [vmem:[%s510_s22 + $0x8] sm:$0xff]   ;;  %s2640_s2 = sld [smem:[#allocation48_spill]]  ;;  %vm654_vm1 = vcmask 261120   ;;  %s2641_s24 = sld [smem:[#allocation52_spill]]  ;;  %vm779_vm2 = vcmask 130048  }
 0x111   : > { %1187 = vmatprep.subr.bf16.mxu0 %v1787_v0  ;;  %1191 = vmatprep.mubr.msk.bf16.mxu0 %vm1788_vm0, %v1787_v0  ;;  %v1417_v6 = vld [vmem:[%s501_s12] sm:$0xff]   ;;  %v1418_v18 = vld [vmem:[%s483_s13] sm:$0xff]   ;;  %v834_v29 = vshrl.u32 %v833_v23, 7  ;;  %s2646_s13 = sld [smem:[#allocation42_spill]]  ;;  %s2647_s12 = sld [smem:[#allocation33_spill]]  ;;  %vm912_vm7 = vcmask 257024  }
 0x112   : > { %1196 = vmatpush3.bf16.msra.mxu1 %v1412_v1  ;;  %1188 = vmatpush3.bf16.msra.mxu0 %v1415_v3  ;;  %s1789_s22 = smov [#allocation16]  }
 0x113   : > { %1197 = vmatprep.subr.bf16.mxu1 %v1787_v0  ;;  %1189 = vmatprep.subr.bf16.mxu0 %v1787_v0  ;;  %v835_v33 = vadd.s32 8, %v834_v29 }
 0x115   : > { %s584_s21 = sld [smem:[#allocation5 + %s2639_s16]] }
 0x116   : > { %1198 = vmatpush3.bf16.msra.mxu1 %v1413_v2  ;;  %1190 = vmatpush3.bf16.msra.mxu0 %v1416_v4  ;;  %s2387_s4 = sld [smem:[#allocation7 + %s2639_s16]] }
 0x117   : > { %1203 = vmatprep.subr.bf16.mxu0 %v1787_v0  ;;  %s601_s0 = sld [smem:[#allocation6 + %s2639_s16]]  ;;  %p2648_p0 = scmp.ne.s32.totalorder %s2646_s13, 0 }
 0x118   : > { %s606_s19 = sld [smem:[#allocation6 + %s2639_s16]]  ;;  %s578_s5 = sand.u32 1, %s2647_s12  }
 0x119   : > { %1192 = vmatmul.mubr.msk.bf16.vlgmr.msra.gmra.mrb[0].mxu0 %vm654_vm1, %v1417_v6  ;;  %s611_s7 = sld [smem:[#allocation6 + %s2639_s16]]  ;;  %s2706_s16 = smov (!%p2648_p0, %s2639_s16), 0 }
 0x11a   : > { %1205 = vmatprep.mubr.msk.bf16.mxu0 %vm1788_vm0, %v1787_v0  ;;  %s1227_s15 = scalar_select %p2648_p0, [#allocation6], [#allocation21] }
 0x11b   : > { %p586_p1 = scmp.lt.s32.totalorder %s584_s21, 1  ;;  %s1148_s29 = sshll.u32 %s578_s5, 3 }
 0x11c   : > { %s839_s8 = scvt.s32.f32 %s2387_s4  ;;  %v836_v32 = vstv %s2387_s4  ;;  %s2651_s12 = sld [smem:[#allocation55_spill]] }
 0x11d   : > { %s2700_s21 = smov (!%p586_p1, %s584_s21), 1  ;;  %p602_p9 = scmp.lt.s32.totalorder %s601_s0, 1  ;;  %vm2401_vm3 = vcmp.lt.s32.totalorder %v834_v29, %v836_v32  ;;  %vm2405_vm4 = vcmp.lt.s32.totalorder %v835_v33, %v836_v32 }
 0x11e   : > { %s1175_s26 = sshll.u32 %s2700_s21, 3  ;;  %v840_v7 = vstv %s839_s8  ;;  %p607_p6 = scmp.lt.s32.totalorder %s606_s19, 1 }
 0x11f   : > { %s593_s6 = scalar_lea.vmem %s2640_s2, %s1175_s26  ;;  %1419 = vrcp.f32 %v840_v7  ;;  %s2702_s0 = smov (!%p602_p9, %s601_s0), 1 }
 0x120   : > { %v1414_v5 = vld [vmem:[%s593_s6] sm:$0xff]   ;;  %s604_s10 = scalar_lea.vmem %s2641_s24, %s2702_s0  ;;  %p612_p5 = scmp.lt.s32.totalorder %s611_s7, 1 }
 0x121   : > { %1200 = vmatmul.mubr.msk.bf16.vlgmr.msra.gmra.mrb[0].mxu1 %vm654_vm1, %v1414_v5  ;;  %v1151_v10 = vld [vmem:[%s604_s10] ss:$0 sm:$0xff]  ;;  %s2704_s19 = smov (!%p607_p6, %s606_s19), 1  ;;  %s2649_s26 = sld [smem:[#allocation53_spill]] }
 0x122   : > { %s2708_s7 = smov (!%p612_p5, %s611_s7), 1  ;;  %s923_s2 = sld [smem:[%s1227_s15 + %s2706_s16]] }
 0x123   : > { %s2650_s8 = sld [smem:[#allocation54_spill]]  ;;  %s580_s24 = scalar_lea.vmem [#allocation16], %s1148_s29 }
 0x124   : > { %s930_s10 = sshll.u32 %s580_s24, 4  ;;  %s1587_s21 = sshll.u32 %s1789_s22, 4  ;;  %s2440_s10 = int_to_ptr.vmem [resolvable:$true] %s930_s10  ;;  %s1588_s21 = int_to_ptr.vmem [resolvable:$false] %s1587_s21 }
 0x125   : > { %s1583_s15 = scalar_lea.vmem %s2440_s10, 128  ;;  %p1590_p3 = scmp.lt.s32.totalorder %s2440_s10, %s1588_s21 }
 0x126   : > { %p1584_p13 = scmp.ne.s32.totalorder %s2440_s10, %s1583_s15 }
 0x127   : > { %s609_s9 = scalar_lea.vmem %s2649_s26, %s2704_s19  ;;  %s1589_s26 = scalar_lea.vmem %s1588_s21, 256 }
 0x128   : > { %v1162_v5 = vld [vmem:[%s609_s9] ss:$0 sm:$0xff]  ;;  %s1178_s1 = sshll.u32 %s923_s2, 7  ;;  %p1585_p7 = pnand %p1584_p13, %p2648_p0 }
 0x129   : > { %v1420_v8 = vpop.eup %1419  ;;  %s614_s0 = scalar_lea.vmem %s2650_s8, %s2708_s7  ;;  %s2438_s19 = scalar_lea.hbm %s2651_s12, %s1178_s1 }
 0x12a   : > { %1209 = vpush %v1420_v8  ;;  %v1163_v8 = vld [vmem:[%s614_s0] ss:$0 sm:$0xff]  ;;  %s2442_s7 = scalar_lea.sflag [#allocation10], %s578_s5  ;;  %p1586_p2 = pneg %p1585_p7 }
 0x12b   : > { %p1591_p8 = scmp.lt.s32.totalorder %s1589_s26, %s1583_s15 }
 0x12d   : > { %p1592_p10 = por %p1591_p8, %p1590_p3 }
 0x12f   : > { %p1593_p12 = pnand %p1592_p10, %p1586_p2 }
 0x15b   : > { %s1210_s20 = spop %1209 }
 0x15c   : > { %v858_v48 = vstv %s1210_s20 }
 0x1ec   : > { %v692_v13 = vpop.f32.mrb[0].mxu0 }
 0x1ed   : > { %v693_v16 = vadd.f32 %v1151_v10, %v692_v13  ;;  %v1193_v17 = vpop.f32.mrb[1].mxu0 }
 0x1ee   : > { %v695_v19 = vpop.f32.mrb[2].mxu0 }
 0x1ef   : > { %699 = vst.msk [vmem:[#allocation2] sm:$0xff] %vm654_vm1, %v693_v16  ;;  %v696_v20 = vadd.f32 %v1151_v10, %v695_v19  ;;  %v1194_v21 = vpop.f32.mrb[3].mxu0 }
 0x1f1   : > { %700 = vst.msk [vmem:[#allocation2 + $0x8] sm:$0xff] %vm654_vm1, %v696_v20 }
 0x1f4   : > { %v762_v9 = vpop.f32.mrb[0].mxu1 }
 0x1f5   : > { %v1201_v11 = vpop.f32.mrb[1].mxu1 }
 0x1f6   : > { %v765_v12 = vpop.f32.mrb[2].mxu1  ;;  %v769_v22 = vld [vmem:[#allocation2] sm:$0xff] }
 0x1f7   : > { %v773_v14 = vpack.c.bf16 %v765_v12, %v762_v9  ;;  %v1202_v15 = vpop.f32.mrb[3].mxu1 }
 0x1f8   : > { %v770_v27 = vld [vmem:[#allocation2 + $0x8] sm:$0xff] }
 0x1f9   : > { %1204 = vmatpush3.bf16.msra.mxu0 %v773_v14 }
 0x1fc   : > { %1206 = vmatmul.mubr.msk.bf16.vlgmr.msra.gmra.mrb[4].mxu0 %vm779_vm2, %v1418_v18 }
 0x2cf   : > { %v817_v24 = vpop.f32.mrb[4].mxu0 }
 0x2d0   : > { %v824_v25 = vadd.f32 %v817_v24, %v769_v22  ;;  %v1207_v26 = vpop.f32.mrb[5].mxu0 }
 0x2d1   : > { %v820_v28 = vpop.f32.mrb[6].mxu0 }
 0x2d2   : > { %826 = vst.msk [vmem:[#allocation2] sm:$0xff] %vm654_vm1, %v824_v25  ;;  %v825_v30 = vadd.f32 %v820_v28, %v770_v27  ;;  %v1208_v31 = vpop.f32.mrb[7].mxu0 }
 0x2d4   : > { %827 = vst.msk [vmem:[#allocation2 + $0x8] sm:$0xff] %vm654_vm1, %v825_v30 }
 0x2d9   : > { %v830_v35 = vld [vmem:[#allocation2] sm:$0xff] }
 0x2da   : > { %v847_v37 = vsel %vm2401_vm3, %v830_v35, 0.0 }
 0x2db   : > { %v831_v38 = vld [vmem:[#allocation2 + $0x8] sm:$0xff]  ;;  %v849_v40 = vsel %vm654_vm1, %v847_v37, 0.0 }
 0x2dc   : > { %v848_v39 = vsel %vm2405_vm4, %v831_v38, 0.0 }
 0x2dd   : > { %v850_v41 = vsel %vm654_vm1, %v848_v39, 0.0 }
 0x2de   : > { %v851_v42 = vadd.f32 %v850_v41, %v849_v40 }
 0x2e0   : > { %v852_v43 = vrot.slane %v851_v42, 4 }
 0x2e2   : > { %v853_v44 = vadd.f32 %v852_v43, %v851_v42 }
 0x2e4   : > { %v854_v45 = vrot.slane %v853_v44, 2 }
 0x2e6   : > { %v855_v46 = vadd.f32 %v854_v45, %v853_v44 }
 0x2e8   : > { %v856_v47 = vrot.slane %v855_v46, 1 }
 0x2ea   : > { %v857_v49 = vadd.f32 %v856_v47, %v855_v46 }
 0x2ec   : > { %v859_v50 = vmul.f32 %v858_v48, %v857_v49 }
 0x2ee   : > { %v860_v51 = vsub.f32 %v830_v35, %v859_v50  ;;  %v861_v52 = vsub.f32 %v831_v38, %v859_v50 }
 0x2f0   : > { %v862_v53 = vsel %vm2401_vm3, %v860_v51, 0.0  ;;  %v863_v54 = vsel %vm2405_vm4, %v861_v52, 0.0 }
 0x2f1   : > { %v864_v55 = vmul.f32 %v862_v53, %v862_v53  ;;  %v865_v56 = vmul.f32 %v863_v54, %v863_v54 }
 0x2f3   : > { %v866_v57 = vsel %vm654_vm1, %v864_v55, 0.0  ;;  %v867_v58 = vsel %vm654_vm1, %v865_v56, 0.0 }
 0x2f4   : > { %v868_v59 = vadd.f32 %v867_v58, %v866_v57 }
 0x2f6   : > { %v869_v60 = vrot.slane %v868_v59, 4 }
 0x2f8   : > { %v870_v61 = vadd.f32 %v869_v60, %v868_v59 }
 0x2fa   : > { %v871_v62 = vrot.slane %v870_v61, 2 }
 0x2fc   : > { %v872_v63 = vadd.f32 %v871_v62, %v870_v61 }
 0x2fe   : > { %v873_v0 = vrot.slane %v872_v63, 1 }
 0x300   : > { %v874_v1 = vadd.f32 %v873_v0, %v872_v63 }
 0x302   : > { %v875_v2 = vmul.f32 %v874_v1, %v858_v48 }
 0x304   : > { %v876_v3 = vadd.f32 1e-05, %v875_v2 }
 0x306   : > { %1421 = vrsqrt.f32 %v876_v3 }
 0x310   : > { %v1422_v4 = vpop.eup %1421 }
 0x311   : > { %v878_v6 = vmul.f32 %v1422_v4, %v860_v51  ;;  %v879_v7 = vmul.f32 %v1422_v4, %v861_v52 }
 0x313   : > { %v887_v9 = vmul.f32 %v1162_v5, %v878_v6  ;;  %v888_v10 = vmul.f32 %v1162_v5, %v879_v7 }
 0x315   : > { %v896_v11 = vadd.f32 %v1163_v8, %v887_v9  ;;  %v897_v12 = vadd.f32 %v1163_v8, %v888_v10 }
 0x317   : > { %vm898_vm5 = vcmp.gt.f32.partialorder %v896_v11, 0.0  ;;  %vm899_vm6 = vcmp.gt.f32.partialorder %v897_v12, 0.0  ;;  %v900_v13 = vmul.f32 0.01, %v896_v11  ;;  %v901_v14 = vmul.f32 0.01, %v897_v12 }
 0x319   : > { %v902_v15 = vsel %vm898_vm5, %v896_v11, %v900_v13  ;;  %v903_v16 = vsel %vm899_vm6, %v897_v12, %v901_v14 }
 0x31a   : > { %v1176_v17 = vpack.c.bf16 %v902_v15, %v902_v15  ;;  %v1177_v18 = vpack.c.bf16 %v903_v16, %v903_v16 }
 0x31c   : > { %913 = vst.msk [vmem:[%s580_s24] sm:$0xf] %vm912_vm7, %v1176_v17  ;;  %914 = vst.msk [vmem:[%s580_s24 + $0x4] sm:$0xf] %vm912_vm7, %v1177_v18 }
 0x31d   : > { %1596 = shalt.err (!%p1593_p12)
}
 0x31e   : > { %s1597_s9 = scalar_lea.hbm %s2438_s19, 128  ;;  %s1601_s6 = scalar_lea.hbm %s2651_s12, 256 }
 0x31f   : > { %p1598_p4 = scmp.ne.s32.totalorder %s2438_s19, %s1597_s9  ;;  %p1602_p9 = scmp.lt.u32.totalorder %s2438_s19, %s2651_s12 }
 0x320   : > { %p1603_p6 = scmp.lt.u32.totalorder %s1601_s6, %s1597_s9  ;;  %p1605_p13 = scmp.lt.u32.totalorder %s1597_s9, %s2438_s19 }
 0x321   : > { %p1599_p11 = pnand %p1598_p4, %p2648_p0 }
 0x322   : > { %p1604_p5 = por %p1603_p6, %p1602_p9 }
 0x323   : > { %p1600_p1 = pneg %p1599_p11 }
 0x324   : > { %p1606_p7 = por %p1605_p13, %p1604_p5 }
 0x326   : > { %p1607_p2 = pnand %p1606_p7, %p1600_p1 }
 0x328   : > { %1610 = shalt.err (!%p1607_p2)
}
 0x329   : > { %s1790_s0 = smov 64   ;;  %s1791_s29 = smov 4  }
 0x32a   : > { %1229 = dma.vmem_to_hbm [thread:$0]  (%p2648_p0), %s2440_s10, 128, %s2438_s19, %s2442_s7, %s1790_s0, %s1790_s0, %s1791_s29  }
 0x32b PF: > { %s2652_s1 = sld [smem:[#allocation32_spill]]  ;;  %p2653_p3 = scmp.ne.s32.totalorder %s2595_s30, 0 }
 0x32c   : > { %p2654_p8 = scmp.ge.s32.totalorder %s1775_s18, 2 }
 0x32e   : > { %p1253_p10 = pnand %p2654_p8, %p2653_p3 }
 0x331   : > { %s945_s24 = sand.u32 1, %s2652_s1  }
 0x332   : > { %s946_s16 = scalar_lea.sflag [#allocation10], %s945_s24 }
 0x333   : > { %1702 = dma.done.wait (!%p1253_p10), %s946_s16, 128  }
 0x334   : > { %1704 = vsyncadd (!%p1253_p10), %s946_s16, 4294967168  ;;  %s44_s18 = sadd.s32 1, %s1775_s18   ;;  %s2656_s2 = sld [smem:[#allocation33_spill]] }
 0x335   : > { %p2472_p12 = scmp.ge.s32.totalorder %s44_s18, 4   ;;  %s2657_s13 = sld [smem:[#allocation44_spill]] }
 0x336   : > { %s2658_s10 = sld [smem:[#allocation35_spill]]  ;;  %s2660_s29 = sld [smem:[#allocation36_spill]] }
 0x337   : > { %s2659_s30 = sld [smem:[#allocation46_spill]]  ;;  %s2661_s19 = sld [smem:[#allocation37_spill]] }
 0x338   : > { %s2662_s7 = sld [smem:[#allocation43_spill]]  ;;  %s2663_s15 = sld [smem:[#allocation38_spill]] }
 0x339   : > { %s2664_s22 = sld [smem:[#allocation45_spill]]  ;;  %s2665_s21 = sld [smem:[#allocation40_spill]] }
 0x33a   : > { %s2666_s0 = smov %s1715_s23  ;;  %s2668_s24 = smov %s1723_s3 }
 0x33b   : > { %s2667_s23 = smov %s2657_s13  ;;  %s2669_s3 = smov %s1727_s25 }
 0x33c   : > { %s2670_s25 = smov %s2301_s28  ;;  %s2671_s26 = smov %s1735_s27 }
 0x33d   : > { %s2672_s27 = smov %s2658_s10  ;;  %s2673_s28 = smov %s2659_s30 }
 0x33e   : > { %s2674_s30 = smov %s2661_s19  ;;  %s2675_s13 = smov %s2662_s7 }
 0x33f   : > { %s2676_s1 = smov %s1759_s14  ;;  %s2677_s14 = smov %s2663_s15 }
 0x340   : > { %s2678_s15 = smov %s2664_s22  ;;  %s2679_s16 = smov %s1771_s17 }
 0x341   : > { %s2680_s17 = smov %s2665_s21  ;;  %43 = sbr.rel (!%p2472_p12) target bundleno = 53 (0x35), region = 154 }
 0x348   :  { %951 = vsyncpa [#allocation9], 1 }
 0x349   :  { %953 = vsyncpa [#allocation9 + $0x1], 1 }
 0x34a   :  { %954 = vsyncpa [#allocation12], 1 }
 0x34b   :  { %956 = vsyncpa [#allocation12 + $0x1], 1 }
 0x34c   :  { %957 = vsyncpa [#allocation15], 1 }
 0x34d   :  { %959 = vsyncpa [#allocation15 + $0x1], 1 }
 0x34e   :  { %960 = vsyncpa [#allocation10], 1 }
 0x34f   :  { %962 = vsyncpa [#allocation10 + $0x1], 1 }

</bundles_post_ra>
